<compile_context>
chip_gen: v5e
topology: v5e:2x2
jax: 0.10.0
libtpu: 0.0.40
codegen_flags: <defaults>
</compile_context>

<pallas_src>
import functools
import operator

import jax
import jax.numpy as jnp
from jax.experimental import pallas as pl
from jax.experimental.pallas import tpu as pltpu

_MIB = 1024 * 1024


def _round_up(x, m):
    return ((x + m - 1) // m) * m


# --------------------------------------------------------------------------- #
# Kernel
# --------------------------------------------------------------------------- #
def _global_serial_kernel(x_ref, wd_ref, bd_ref, wu_ref, bu_ref, o_ref, *,
                          eps, inv_d, n_pad_lanes, dot_precision):
    # x_ref : (TR, Dp)  row tile of the flattened (zero-padded) input
    # wd_ref: (Dp, Bp)  gamma-folded down_proj weight (x @ Wd layout)
    # bd_ref: (1, Bp)   beta-folded down_proj bias (f32)
    # wu_ref: (Bp, Dp)  scale-folded up_proj weight (h @ Wu layout)
    # bu_ref: (1, Dp)   scale-folded up_proj bias (f32)
    x = x_ref[...].astype(jnp.float32)

    # LayerNorm statistics over the true channel dim (padded lanes are zero;
    # their spurious contribution to the variance is subtracted exactly).
    mean = jnp.sum(x, axis=-1, keepdims=True) * inv_d
    xc = x - mean
    ssq = jnp.sum(xc * xc, axis=-1, keepdims=True)
    if n_pad_lanes:
        ssq = ssq - n_pad_lanes * mean * mean
    var = ssq * inv_d
    xn = xc * jax.lax.rsqrt(var + eps)
    # gamma/beta are folded into wd_ref/bd_ref; padded lanes of xn hit zero
    # weight rows, so no masking is needed.

    h = jnp.dot(xn.astype(wd_ref.dtype), wd_ref[...],
                preferred_element_type=jnp.float32, precision=dot_precision)
    h = jnp.maximum(h + bd_ref[...], 0.0)

    y = jnp.dot(h.astype(wu_ref.dtype), wu_ref[...],
                preferred_element_type=jnp.float32, precision=dot_precision)
    o_ref[...] = (y + bu_ref[...]).astype(o_ref.dtype)


# --------------------------------------------------------------------------- #
# Wrapper
# --------------------------------------------------------------------------- #
def _tpu_generation_is_v7():
    try:
        return "v7" in jax.devices()[0].device_kind.lower()
    except Exception:
        return False


def global_serial_forward(x, params, *, eps=1e-5):
    """Apply Global_Serial to x of shape (..., in_dim)."""
    in_dim = x.shape[-1]
    bottle_dim = params["w_down"].shape[1]
    assert params["w_down"].shape == (in_dim, bottle_dim)
    assert params["w_up"].shape == (bottle_dim, in_dim)

    f32 = jnp.float32
    w_dtype = params["w_down"].dtype          # MXU operand dtype (bf16 stays bf16)

    # ---- fold gamma/beta/scale into the projection weights (tiny, one-time) --
    gamma = params["gamma"].astype(f32)
    beta = params["beta"].astype(f32)
    wd = params["w_down"].astype(f32)
    bd = params["b_down"].astype(f32)
    wu = params["w_up"].astype(f32)
    bu = params["b_up"].astype(f32)
    scale = params["scale"].astype(f32).reshape(())

    wd_eff = gamma[:, None] * wd
    bd_eff = jnp.dot(beta, wd, precision=jax.lax.Precision.HIGHEST) + bd
    wu_eff = wu * scale
    bu_eff = bu * scale

    # ---- lane-density padding (multiples of 128 on the minor dims) ----------
    d_pad = _round_up(in_dim, 128)
    b_pad = _round_up(bottle_dim, 128)
    if d_pad != in_dim or b_pad != bottle_dim:
        wd_eff = jnp.pad(wd_eff, ((0, d_pad - in_dim), (0, b_pad - bottle_dim)))
        bd_eff = jnp.pad(bd_eff, ((0, b_pad - bottle_dim),))
        wu_eff = jnp.pad(wu_eff, ((0, b_pad - bottle_dim), (0, d_pad - in_dim)))
        bu_eff = jnp.pad(bu_eff, ((0, d_pad - in_dim),))
    wd_eff = wd_eff.astype(w_dtype)
    wu_eff = wu_eff.astype(w_dtype)
    bd_eff = bd_eff.reshape(1, b_pad).astype(f32)
    bu_eff = bu_eff.reshape(1, d_pad).astype(f32)

    # ---- flatten rows (pad channels only when in_dim % 128 != 0) ------------
    orig_shape = x.shape
    n_rows = int(functools.reduce(operator.mul, x.shape[:-1], 1))
    x2 = x.reshape(n_rows, in_dim)
    if d_pad != in_dim:
        x2 = jnp.pad(x2, ((0, 0), (0, d_pad - in_dim)))

    # ---- generation-aware tile planning --------------------------------------
    is_v7 = _tpu_generation_is_v7()
    vmem_budget = (48 if is_v7 else 96) * _MIB      # 64 MiB phys v7x, 128 MiB v5e/v6e
    tile_target = (4 if is_v7 else 8) * _MIB

    x_item = jnp.dtype(x.dtype).itemsize
    sublane = max(8, 32 // x_item)                  # 8 f32, 16 bf16, 32 int8/fp8

    w_item = jnp.dtype(w_dtype).itemsize
    weight_bytes = ((wd_eff.size + wu_eff.size) * w_item
                    + (bd_eff.size + bu_eff.size) * 4)
    # TODO(synk): if the resident weights alone exceed the v7x VMEM budget, fall
    # back to a second grid axis tiling Wu/bu/out columns instead of keeping
    # full weights resident.

    # per-row VMEM: 2x input tile bufs + 2x output tile bufs + ~3 f32 temps
    per_row = 2 * d_pad * x_item + 2 * d_pad * x_item + 3 * max(d_pad, b_pad) * 4
    headroom = 4 * _MIB
    avail = max(sublane * per_row, vmem_budget - weight_bytes - headroom)

    tr_cap = min(tile_target // max(1, d_pad * x_item), avail // per_row)
    tr_cap = max(sublane, (tr_cap // sublane) * sublane)

    if n_rows <= sublane:
        tile_rows = n_rows                          # block == full row extent
    else:
        # >= 2 steps so both v7x TensorCores are fed; balance the ragged tail.
        n_steps = max(2, pl.cdiv(n_rows, tr_cap))
        tile_rows = min(_round_up(pl.cdiv(n_rows, n_steps), sublane),
                        _round_up(n_rows, sublane))
    grid = (pl.cdiv(n_rows, tile_rows),)

    vmem_limit = weight_bytes + tile_rows * per_row + headroom
    vmem_limit = int(min(vmem_budget, max(32 * _MIB, vmem_limit)))

    dot_precision = (jax.lax.Precision.HIGHEST if w_dtype == jnp.float32
                     else jax.lax.Precision.DEFAULT)

    out = pl.pallas_call(
        functools.partial(
            _global_serial_kernel,
            eps=float(eps),
            inv_d=1.0 / float(in_dim),
            n_pad_lanes=int(d_pad - in_dim),
            dot_precision=dot_precision,
        ),
        out_shape=jax.ShapeDtypeStruct((n_rows, d_pad), x.dtype),
        grid_spec=pltpu.PrefetchScalarGridSpec(
            num_scalar_prefetch=0,
            grid=grid,
            in_specs=[
                pl.BlockSpec((tile_rows, d_pad), lambda i: (i, 0)),          # x
                pl.BlockSpec((d_pad, b_pad), lambda i: (0, 0),
                             pipeline_mode=pl.Buffered(1)),                  # Wd'
                pl.BlockSpec((1, b_pad), lambda i: (0, 0),
                             pipeline_mode=pl.Buffered(1)),                  # bd'
                pl.BlockSpec((b_pad, d_pad), lambda i: (0, 0),
                             pipeline_mode=pl.Buffered(1)),                  # Wu'
                pl.BlockSpec((1, d_pad), lambda i: (0, 0),
                             pipeline_mode=pl.Buffered(1)),                  # bu'
            ],
            out_specs=pl.BlockSpec((tile_rows, d_pad), lambda i: (i, 0)),
        ),
        compiler_params=pltpu.CompilerParams(
            dimension_semantics=("parallel",),
            vmem_limit_bytes=vmem_limit,
        ),
    )(x2, wd_eff, bd_eff, wu_eff, bu_eff)

    if d_pad != in_dim:
        out = out[:, :in_dim]
    return out.reshape(orig_shape)


# --------------------------------------------------------------------------- #
# Parameter init (mirrors the PyTorch module) and a pure-JAX reference.
# --------------------------------------------------------------------------- #
def init_global_serial_params(key, in_dim, bottle_dim, dtype=jnp.float32):
    """PyTorch-style init: LN(1,0); down = kaiming_normal(a=sqrt(5)); up = 0;
    biases = 0; scale = 1.  Weights stored transposed (in, out) for x @ W."""
    std = (1.0 / (3.0 * in_dim)) ** 0.5
    w_down = std * jax.random.normal(key, (in_dim, bottle_dim), dtype=dtype)
    return dict(
        gamma=jnp.ones((in_dim,), dtype),
        beta=jnp.zeros((in_dim,), dtype),
        w_down=w_down,
        b_down=jnp.zeros((bottle_dim,), dtype),
        w_up=jnp.zeros((bottle_dim, in_dim), dtype),
        b_up=jnp.zeros((in_dim,), dtype),
        scale=jnp.ones((1,), dtype),
    )


def global_serial_reference(x, params, eps=1e-5):
    xf = x.astype(jnp.float32)
    mean = jnp.mean(xf, axis=-1, keepdims=True)
    var = jnp.mean((xf - mean) ** 2, axis=-1, keepdims=True)
    xn = (xf - mean) * jax.lax.rsqrt(var + eps)
    xn = xn * params["gamma"].astype(jnp.float32) + params["beta"].astype(jnp.float32)
    h = jnp.dot(xn, params["w_down"].astype(jnp.float32),
                precision=jax.lax.Precision.HIGHEST) + params["b_down"].astype(jnp.float32)
    h = jnp.maximum(h, 0.0)
    y = jnp.dot(h, params["w_up"].astype(jnp.float32),
                precision=jax.lax.Precision.HIGHEST) + params["b_up"].astype(jnp.float32)
    y = y * params["scale"].astype(jnp.float32).reshape(())
    return y.astype(x.dtype)


def _random_params(keys, in_dim, bottle_dim, dtype=jnp.float32):
    k_g, k_be, k_wd, k_bd, k_wu, k_bu = keys
    return dict(
        gamma=(1.0 + 0.1 * jax.random.normal(k_g, (in_dim,))).astype(dtype),
        beta=(0.1 * jax.random.normal(k_be, (in_dim,))).astype(dtype),
        w_down=(0.1 * jax.random.normal(k_wd, (in_dim, bottle_dim))).astype(dtype),
        b_down=(0.05 * jax.random.normal(k_bd, (bottle_dim,))).astype(dtype),
        w_up=(0.1 * jax.random.normal(k_wu, (bottle_dim, in_dim))).astype(dtype),
        b_up=(0.05 * jax.random.normal(k_bu, (in_dim,))).astype(dtype),
        scale=jnp.array([0.5], dtype),
    )


# --------------------------------------------------------------------------- #
# Test
# --------------------------------------------------------------------------- #
if __name__ == "__main__":
    key = jax.random.PRNGKey(0)
    keys = jax.random.split(key, 12)
    in_dim, bottle_dim = 128, 32

    params = _random_params(keys[0:6], in_dim, bottle_dim, jnp.float32)

    # Case 1: 3D f32 input (batch=2, seq=8, hidden=128).
    x3 = jax.random.normal(keys[6], (2, 8, in_dim), dtype=jnp.float32)
    y3 = global_serial_forward(x3, params)
    jax.block_until_ready(y3)
    ref3 = global_serial_reference(x3, params)
    assert y3.shape == x3.shape
    assert jnp.allclose(y3, ref3, rtol=2e-3, atol=1e-5), "3D f32 mismatch"

    # Case 2: 2D input with a ragged row count (exercises cdiv last block).
    x2 = jax.random.normal(keys[7], (20, in_dim), dtype=jnp.float32)
    y2 = global_serial_forward(x2, params)
    jax.block_until_ready(y2)
    ref2 = global_serial_reference(x2, params)
    assert jnp.allclose(y2, ref2, rtol=2e-3, atol=1e-5), "2D f32 mismatch"

    # Case 3: channel dim not a multiple of 128 (exercises the lane-padding
    # path and the padded-lane LayerNorm correction).
    in_dim_np, bottle_np = 96, 24
    params_np = _random_params(keys[0:6], in_dim_np, bottle_np, jnp.float32)
    xnp = jax.random.normal(keys[8], (2, 16, in_dim_np), dtype=jnp.float32)
    ynp = global_serial_forward(xnp, params_np)
    jax.block_until_ready(ynp)
    refnp = global_serial_reference(xnp, params_np)
    assert ynp.shape == xnp.shape
    assert jnp.allclose(ynp, refnp, rtol=2e-3, atol=1e-5), "padded-channel mismatch"

    # Case 4: bf16 activations + bf16 weights (bf16 MXU operands, sublane=16).
    params_bf = {k: v.astype(jnp.bfloat16) for k, v in params.items()}
    xb = jax.random.normal(keys[9], (2, 8, in_dim), dtype=jnp.bfloat16)
    yb = global_serial_forward(xb, params_bf)
    jax.block_until_ready(yb)
    refb = global_serial_reference(xb, params_bf)
    assert jnp.allclose(yb.astype(jnp.float32), refb.astype(jnp.float32),
                        rtol=5e-2, atol=2e-2), "bf16 mismatch"

    # Case 5: PyTorch-style init (up_proj zero) -> output must be all zeros.
    params_pt = init_global_serial_params(keys[10], in_dim, bottle_dim)
    y0 = global_serial_forward(x3, params_pt)
    jax.block_until_ready(y0)
    assert jnp.allclose(y0, jnp.zeros_like(y0), atol=1e-6), "zero-init mismatch"

    print("KERNEL_OK")
</pallas_src>

<mosaic_0001>
module attributes {stable_mosaic.version = 11 : i64} {
  func.func @_global_serial_kernel(%arg0: i32, %arg1: memref<8x128xf32, #tpu.memory_space<vmem>>, %arg2: memref<128x128xf32, #tpu.memory_space<vmem>>, %arg3: memref<1x128xf32, #tpu.memory_space<vmem>>, %arg4: memref<128x128xf32, #tpu.memory_space<vmem>>, %arg5: memref<1x128xf32, #tpu.memory_space<vmem>>, %arg6: memref<8x128xf32, #tpu.memory_space<vmem>>) attributes {dimension_semantics = [#tpu.dimension_semantics<parallel>], iteration_bounds = array<i64: 2>, scalar_prefetch = 0 : i64, scratch_operands = 0 : i64, tpu.core_type = #tpu.core_type<tc>, window_params = [{transform_indices = @transform_0, window_bounds = array<i64: 8, 128>}, {pipeline_mode = #tpu.pipeline_mode<synchronous>, transform_indices = @transform_1, window_bounds = array<i64: 128, 128>}, {pipeline_mode = #tpu.pipeline_mode<synchronous>, transform_indices = @transform_2, window_bounds = array<i64: 1, 128>}, {pipeline_mode = #tpu.pipeline_mode<synchronous>, transform_indices = @transform_3, window_bounds = array<i64: 128, 128>}, {pipeline_mode = #tpu.pipeline_mode<synchronous>, transform_indices = @transform_4, window_bounds = array<i64: 1, 128>}, {transform_indices = @transform_5, window_bounds = array<i64: 8, 128>}]} {
    %c0 = arith.constant 0 : index
    %c0_0 = arith.constant 0 : index
    %0 = vector.load %arg1[%c0, %c0_0] : memref<8x128xf32, #tpu.memory_space<vmem>>, vector<8x128xf32>
    %cst = arith.constant dense<0.000000e+00> : vector<8xf32>
    %1 = vector.multi_reduction <add>, %0, %cst [1] : vector<8x128xf32> to vector<8xf32>
    %2 = vector.shape_cast %1 : vector<8xf32> to vector<8x1xf32>
    %cst_1 = arith.constant 7.812500e-03 : f32
    %3 = vector.broadcast %cst_1 : f32 to vector<8x1xf32>
    %4 = arith.mulf %2, %3 : vector<8x1xf32>
    %5 = vector.broadcast %4 : vector<8x1xf32> to vector<8x128xf32>
    %6 = arith.subf %0, %5 : vector<8x128xf32>
    %7 = arith.mulf %6, %6 : vector<8x128xf32>
    %cst_2 = arith.constant dense<0.000000e+00> : vector<8xf32>
    %8 = vector.multi_reduction <add>, %7, %cst_2 [1] : vector<8x128xf32> to vector<8xf32>
    %9 = vector.shape_cast %8 : vector<8xf32> to vector<8x1xf32>
    %cst_3 = arith.constant 7.812500e-03 : f32
    %10 = vector.broadcast %cst_3 : f32 to vector<8x1xf32>
    %11 = arith.mulf %9, %10 : vector<8x1xf32>
    %cst_4 = arith.constant 9.99999974E-6 : f32
    %12 = vector.broadcast %cst_4 : f32 to vector<8x1xf32>
    %13 = arith.addf %11, %12 : vector<8x1xf32>
    %14 = math.rsqrt %13 : vector<8x1xf32>
    %15 = vector.broadcast %14 : vector<8x1xf32> to vector<8x128xf32>
    %16 = arith.mulf %6, %15 : vector<8x128xf32>
    %c0_5 = arith.constant 0 : index
    %c0_6 = arith.constant 0 : index
    %17 = vector.load %arg2[%c0_5, %c0_6] : memref<128x128xf32, #tpu.memory_space<vmem>>, vector<128x128xf32>
    %cst_7 = arith.constant dense<0.000000e+00> : vector<8x128xf32>
    %18 = tpu.matmul %16, %17, %cst_7 {dimension_numbers = #tpu.dot_dimension_numbers<[1], [0], [0], [1], [0, 0, 1, 1], [], []>, precision = #tpu.contract_precision<fp32>} : vector<8x128xf32>, vector<128x128xf32>, vector<8x128xf32> -> vector<8x128xf32>
    %c0_8 = arith.constant 0 : index
    %c0_9 = arith.constant 0 : index
    %19 = vector.load %arg3[%c0_8, %c0_9] : memref<1x128xf32, #tpu.memory_space<vmem>>, vector<1x128xf32>
    %20 = vector.broadcast %19 : vector<1x128xf32> to vector<8x128xf32>
    %21 = arith.addf %18, %20 : vector<8x128xf32>
    %cst_10 = arith.constant 0.000000e+00 : f32
    %22 = vector.broadcast %cst_10 : f32 to vector<8x128xf32>
    %23 = arith.maximumf %21, %22 : vector<8x128xf32>
    %c0_11 = arith.constant 0 : index
    %c0_12 = arith.constant 0 : index
    %24 = vector.load %arg4[%c0_11, %c0_12] : memref<128x128xf32, #tpu.memory_space<vmem>>, vector<128x128xf32>
    %cst_13 = arith.constant dense<0.000000e+00> : vector<8x128xf32>
    %25 = tpu.matmul %23, %24, %cst_13 {dimension_numbers = #tpu.dot_dimension_numbers<[1], [0], [0], [1], [0, 0, 1, 1], [], []>, precision = #tpu.contract_precision<fp32>} : vector<8x128xf32>, vector<128x128xf32>, vector<8x128xf32> -> vector<8x128xf32>
    %c0_14 = arith.constant 0 : index
    %c0_15 = arith.constant 0 : index
    %26 = vector.load %arg5[%c0_14, %c0_15] : memref<1x128xf32, #tpu.memory_space<vmem>>, vector<1x128xf32>
    %27 = vector.broadcast %26 : vector<1x128xf32> to vector<8x128xf32>
    %28 = arith.addf %25, %27 : vector<8x128xf32>
    %c0_16 = arith.constant 0 : index
    %c0_17 = arith.constant 0 : index
    %29 = vector.load %arg6[%c0_16, %c0_17] : memref<8x128xf32, #tpu.memory_space<vmem>>, vector<8x128xf32>
    tpu.vector_store %arg6[%c0_16, %c0_17], %28 {strides = array<i32>} : memref<8x128xf32, #tpu.memory_space<vmem>>, vector<8x128xf32>,
    return
  }
  func.func @transform_0(%arg0: i32) -> (i32, i32) {
    %c0_i32 = arith.constant 0 : i32
    %c0_i32_0 = arith.constant 0 : i32
    return %arg0, %c0_i32 : i32, i32
  }
  func.func @transform_1(%arg0: i32) -> (i32, i32) {
    %c0_i32 = arith.constant 0 : i32
    %c0_i32_0 = arith.constant 0 : i32
    %c0_i32_1 = arith.constant 0 : i32
    return %c0_i32, %c0_i32_0 : i32, i32
  }
  func.func @transform_2(%arg0: i32) -> (i32, i32) {
    %c0_i32 = arith.constant 0 : i32
    %c0_i32_0 = arith.constant 0 : i32
    %c0_i32_1 = arith.constant 0 : i32
    return %c0_i32, %c0_i32_0 : i32, i32
  }
  func.func @transform_3(%arg0: i32) -> (i32, i32) {
    %c0_i32 = arith.constant 0 : i32
    %c0_i32_0 = arith.constant 0 : i32
    %c0_i32_1 = arith.constant 0 : i32
    return %c0_i32, %c0_i32_0 : i32, i32
  }
  func.func @transform_4(%arg0: i32) -> (i32, i32) {
    %c0_i32 = arith.constant 0 : i32
    %c0_i32_0 = arith.constant 0 : i32
    %c0_i32_1 = arith.constant 0 : i32
    return %c0_i32, %c0_i32_0 : i32, i32
  }
  func.func @transform_5(%arg0: i32) -> (i32, i32) {
    %c0_i32 = arith.constant 0 : i32
    %c0_i32_0 = arith.constant 0 : i32
    return %arg0, %c0_i32 : i32, i32
  }
}

</mosaic_0001>

<bundles_post_ra>
// kernel: tpu_custom_call.1
= control target key start
LH: loop header
LB: loop body
LE: loop exit
PB: predicated region body
PF: predicated region fallthrough
CT: control target
= control target key end

     0   :  { %10 = vsyncpa [#allocation3], 0  ;;  %s2016_s0 = inlined_call_operand.hbm [shape: f32[16,128], index: 0, kind: input, shape index: {}]   ;;  %s2017_s1 = inlined_call_operand.hbm [shape: f32[128,128], index: 1, kind: input, shape index: {}]   ;;  %s2018_s2 = inlined_call_operand.vmem [shape: f32[1,128], index: 2, kind: input, shape index: {}]   ;;  %s2019_s3 = inlined_call_operand.hbm [shape: f32[128,128], index: 3, kind: input, shape index: {}]   ;;  %s2020_s4 = inlined_call_operand.vmem [shape: f32[1,128], index: 4, kind: input, shape index: {}]   ;;  %s2021_s5 = inlined_call_operand.hbm [shape: f32[16,128], index: 5, kind: output, shape index: {}]  }
   0x1   :  { %12 = vsyncpa [#allocation3 + $0x1], 0 }
   0x2   :  { %13 = vsyncpa [#allocation6], 0 }
   0x3   :  { %14 = vsyncpa [#allocation4], 0 }
   0x4   :  { %16 = vsyncpa [#allocation4 + $0x1], 0  ;;  %s1410_s18 = smov 0   ;;  %s1412_s19 = smov 0  }
   0x5   :  { %s1414_s20 = smov 0   ;;  %s1416_s21 = smov 0  }
   0x6 LB: > { %s174_s24 = sshll.u32 %s2017_s1, 4  ;;  %s1434_s25 = sadd.s32 4294967295, %s1374_s21   ;;  %s1374_s21 = sphi %s1416_s21, %s2032_s21   ;;  %s1370_s20 = sphi %s1414_s20, %s2031_s20   ;;  %s1366_s19 = sphi %s1412_s19, %s2030_s19   ;;  %s1362_s18 = sphi %s1410_s18, %s2029_s18   ;;  %s175_s24 = int_to_ptr.hbm [resolvable:$true] %s174_s24 }
   0x7   : > { %p1126_p0 = scmp.ge.s32.totalorder %s1374_s21, 1  ;;  %p43_p1 = scmp.eq.s32.totalorder %s1434_s25, 0 }
   0x8   : > { %p163_p2 = scmp.lt.s32.totalorder %s1374_s21, 3  ;;  %s1376_s27 = smov [#allocation5]  }
   0x9   : > { %s176_s28 = sshll.u32 %s1376_s27, 4  ;;  %s191_s6 = sshll.u32 %s2019_s3, 4  ;;  %s177_s28 = int_to_ptr.vmem [resolvable:$true] %s176_s28  ;;  %s192_s6 = int_to_ptr.hbm [resolvable:$true] %s191_s6 }
   0xa   : > { %p1439_p3 = pnand %p1126_p0, %p163_p2  ;;  %s1377_s7 = smov [#allocation7]  }
   0xb   : > { %s193_s8 = sshll.u32 %s1377_s7, 4  ;;  %s1378_s9 = smov 128   ;;  %s194_s8 = int_to_ptr.vmem [resolvable:$true] %s193_s8 }
   0xc   : > { %p1153_p4 = pneg %p1439_p3  ;;  %s1379_s10 = smov 8  }
   0xd   : > { %s1125_s11 = sadd.s32 4294967294, %s1374_s21   ;;  %s1453_s12 = sadd.s32 1, %s1374_s21  }
   0xe   : > { %p1154_p6 = pnand %p1153_p4, %p43_p1  ;;  %s26_s13 = ssub.s32 %s1374_s21, %s1453_s12 }
   0xf   : > { %s29_s14 = sadd.s32 1, %s1370_s20  ;;  %p27_p7 = scmp.eq.s32.totalorder %s26_s13, 0 }
  0x10   : > { %1156 = dma.hbm_to_vmem [thread:$0]  (!%p1154_p6), %s175_s24, 2048, %s177_s28, [#allocation6], %s1378_s9, %s1378_s9, %s1379_s10  }
  0x11   : > { %1159 = dma.hbm_to_vmem [thread:$0]  (!%p1154_p6), %s192_s6, 2048, %s194_s8, [#allocation6], %s1378_s9, %s1378_s9, %s1379_s10  }
  0x12   : > { %p36_p8 = scmp.ne.s32.totalorder %s1370_s20, %s1366_s19  ;;  %p37_p9 = scmp.eq.s32.totalorder %s1374_s21, 0 }
  0x13   : > { %p42_p10 = scmp.ne.s32.totalorder %s1366_s19, %s1362_s18  ;;  %p150_p13 = scmp.eq.s32.totalorder %s1434_s25, 1 }
  0x14   : > { %s1464_s15 = scalar_select %p27_p7, %s1370_s20, %s29_s14  }
  0x15   : > { %p1466_p11 = por %p37_p9, %p36_p8  ;;  %p1472_p12 = por %p43_p1, %p42_p10 }
  0x16   : > { %p156_p0 = scmp.eq.s32.totalorder %s1125_s11, 1  ;;  %p1170_p2 = scmp.lt.s32.totalorder %s1374_s21, 2 }
  0x17   : > { %s210_s22 = sand.u32 1, %s1370_s20   ;;  %p1479_p4 = por %p150_p13, %p36_p8 }
  0x18   : > { %p1483_p6 = por %p156_p0, %p42_p10  ;;  %s1130_s27 = sshll.u32 %s210_s22, 3 }
  0x19   : > { %s1131_s28 = sshll.u32 %s1374_s21, 3  ;;  %s214_s7 = scalar_lea.vmem [#allocation2], %s1130_s27 }
  0x1a   : > { %s218_s6 = scalar_lea.hbm %s2016_s0, %s1131_s28  ;;  %s222_s8 = sshll.u32 %s214_s7, 4  ;;  %s223_s8 = int_to_ptr.vmem [resolvable:$true] %s222_s8 }
  0x1b   : > { %s220_s9 = sshll.u32 %s218_s6, 4  ;;  %p1493_p7 = pnand %p1170_p2, %p1466_p11  ;;  %s221_s9 = int_to_ptr.hbm [resolvable:$true] %s220_s9 }
  0x1c   : > { %s211_s11 = scalar_lea.sflag [#allocation3], %s210_s22  ;;  %s1274_s13 = sshra.s32 %s221_s9, 4  ;;  %s1275_s13 = int_to_ptr.hbm [resolvable:$true] %s1274_s13 }
  0x1d   : > { %s1276_s14 = scalar_lea.hbm %s1275_s13, 8  ;;  %p1278_p9 = pneg %p1493_p7 }
  0x1e   : > { %p1277_p8 = scmp.ne.s32.totalorder %s1275_s13, %s1276_s14  ;;  %s1281_s29 = scalar_lea.hbm %s2016_s0, 16 }
  0x1f   : > { %p1282_p11 = scmp.lt.s32.totalorder %s1275_s13, %s2016_s0  ;;  %p1283_p0 = scmp.lt.s32.totalorder %s1281_s29, %s1276_s14 }
  0x20   : > { %p1279_p10 = pnand %p1278_p9, %p1277_p8 }
  0x21   : > { %p1284_p2 = por %p1283_p0, %p1282_p11 }
  0x22   : > { %p1280_p13 = pneg %p1279_p10 }
  0x24   : > { %p1285_p5 = pnand %p1284_p2, %p1280_p13 }
  0x26   : > { %1288 = shalt.err (!%p1285_p5)
}
  0x27   : > { %1163 = dma.hbm_to_vmem [thread:$0]  (!%p1493_p7), %s221_s9, 128, %s223_s8, %s211_s11  }
  0x28   : > { %231 = sbr.rel (%p1439_p3) target bundleno = 618 (0x26a), region = 40  ;;  %s1510_s22 = sand.u32 (!%p1439_p3), 1, %s1366_s19  }
  0x29   : > { %s1133_s6 = sshll.u32 (!%p1439_p3), %s1510_s22, 3  ;;  %s234_s7 = scalar_lea.sflag (!%p1439_p3), [#allocation3], %s1510_s22 }
  0x2a   : > { %s237_s13 = scalar_lea.vmem (!%p1439_p3), [#allocation2], %s1133_s6 }
  0x2d   : > { %1349 = dma.done.wait (%p1472_p12), %s234_s7, 128  }
  0x2e   : > { %1351 = vsyncadd (%p1472_p12), %s234_s7, 4294967168 }
  0x2f   : > { %1353 = dma.done.wait (%p43_p1), [#allocation6], 4096  }
  0x30   : > { %1355 = vsyncadd (%p43_p1), [#allocation6], 4294963200  ;;  %v1524_v0 = vld [vmem:[%s237_s13] sm:$0xff]  ;;  %v309_v3 = vld [vmem:[#allocation5 + $0x68] sm:$0xff]  ;;  %s1138_s10 = sshll.u32 %s1434_s25, 3  ;;  %s274_s28 = scalar_lea.vmem [#allocation8], %s1133_s6 }
  0x31   : > { %276 = vadd.xlane.f32.xlu0 %v1524_v0  ;;  %v311_v1 = vld [vmem:[#allocation5 + $0x78] sm:$0xff]  ;;  %v310_v2 = vld [vmem:[#allocation5 + $0x70] sm:$0xff]  ;;  %v1531_v6 = vand.u32 4294901760, %v309_v3  ;;  %v308_v7 = vld [vmem:[#allocation5 + $0x60] sm:$0xff]  ;;  %s1031_s27 = scalar_lea.hbm %s2021_s5, %s1138_s10  ;;  %s1033_s29 = sshll.u32 %s274_s28, 4  ;;  %s1034_s29 = int_to_ptr.vmem [resolvable:$true] %s1033_s29 }
  0x32   : > { %v1527_v4 = vand.u32 4294901760, %v311_v1  ;;  %v1529_v5 = vand.u32 4294901760, %v310_v2  ;;  %v307_v8 = vld [vmem:[#allocation5 + $0x58] sm:$0xff]  ;;  %v306_v9 = vld [vmem:[#allocation5 + $0x50] sm:$0xff]  ;;  %v1533_v10 = vand.u32 4294901760, %v308_v7  ;;  %v305_v13 = vld [vmem:[#allocation5 + $0x48] sm:$0xff] }
  0x33   : > { %v1535_v11 = vand.u32 4294901760, %v307_v8  ;;  %v1537_v12 = vand.u32 4294901760, %v306_v9  ;;  %v304_v14 = vld [vmem:[#allocation5 + $0x40] sm:$0xff]  ;;  %v1546_v17 = vsub.f32 %v309_v3, %v1531_v6  ;;  %v1549_v18 = vand.u32 4294901760, %v305_v13  ;;  %v303_v34 = vld [vmem:[#allocation5 + $0x38] sm:$0xff]  ;;  %v302_v35 = vld [vmem:[#allocation5 + $0x30] sm:$0xff] }
  0x34   : > { %v1540_v15 = vsub.f32 %v311_v1, %v1527_v4  ;;  %v1543_v16 = vsub.f32 %v310_v2, %v1529_v5  ;;  %317 = vmatpush.msra.mxu0 %v1527_v4  ;;  %513 = vmatpush.msra.mxu3 %v1527_v4  ;;  %v1553_v19 = vsub.f32 %v308_v7, %v1533_v10  ;;  %v1561_v22 = vand.u32 4294901760, %v304_v14  ;;  %v301_v36 = vld [vmem:[#allocation5 + $0x28] sm:$0xff]  ;;  %v300_v42 = vld [vmem:[#allocation5 + $0x20] sm:$0xff]  ;;  %v299_v49 = vld [vmem:[#allocation5 + $0x18] sm:$0xff]  ;;  %s1035_s30 = sshll.u32 %s1031_s27, 4  ;;  %s1021_s25 = scalar_lea.sflag [#allocation4], %s1510_s22  ;;  %s1036_s30 = int_to_ptr.hbm [resolvable:$true] %s1035_s30 }
  0x35   : > { %v1556_v20 = vsub.f32 %v307_v8, %v1535_v11  ;;  %v1559_v21 = vsub.f32 %v306_v9, %v1537_v12  ;;  %v371_v25 = vand.u32 4294901760, %v1546_v17  ;;  %v1571_v28 = vsub.f32 %v305_v13, %v1549_v18  ;;  %v298_v55 = vld [vmem:[#allocation5 + $0x10] sm:$0xff]  ;;  %s1318_s16 = sshra.s32 %s1036_s30, 4  ;;  %s1324_s6 = scalar_lea.hbm %s2021_s5, 16  ;;  %s1319_s16 = int_to_ptr.hbm [resolvable:$true] %s1318_s16 }
  0x36   : > { %v359_v23 = vand.u32 4294901760, %v1540_v15  ;;  %v365_v24 = vand.u32 4294901760, %v1543_v16  ;;  %319 = vmatpush.msra.mxu0 %v1529_v5  ;;  %460 = vmatpush.msra.mxu2 %v1540_v15  ;;  %v377_v26 = vand.u32 4294901760, %v1553_v19  ;;  %v1587_v33 = vsub.f32 %v304_v14, %v1561_v22  ;;  %s1320_s7 = scalar_lea.hbm %s1319_s16, 8  ;;  %p1325_p12 = scmp.lt.s32.totalorder %s1319_s16, %s2021_s5 }
  0x37   : > { %v383_v27 = vand.u32 4294901760, %v1556_v20  ;;  %515 = vmatpush.msra.mxu3 %v1529_v5  ;;  %v372_v31 = vsub.f32 %v1546_v17, %v371_v25  ;;  %v389_v32 = vand.u32 4294901760, %v1559_v21  ;;  %v395_v41 = vand.u32 4294901760, %v1571_v28  ;;  %p1321_p1 = scmp.ne.s32.totalorder %s1319_s16, %s1320_s7  ;;  %p1326_p7 = scmp.lt.s32.totalorder %s1324_s6, %s1320_s7 }
  0x38   : > { %v360_v29 = vsub.f32 %v1540_v15, %v359_v23  ;;  %v366_v30 = vsub.f32 %v1543_v16, %v365_v24  ;;  %321 = vmatpush.msra.mxu0 %v1531_v6  ;;  %463 = vmatpush.msra.mxu2 %v1543_v16  ;;  %v378_v39 = vsub.f32 %v1553_v19, %v377_v26  ;;  %v1601_v44 = vand.u32 4294901760, %v303_v34  ;;  %v671_v15 = vld [vmem:[#allocation7 + $0x68] sm:$0xff] }
  0x39   : > { %517 = vmatpush.msra.mxu3 %v1531_v6  ;;  %v384_v40 = vsub.f32 %v1556_v20, %v383_v27  ;;  %v373_v43 = vand.u32 4294901760, %v372_v31  ;;  %v1603_v45 = vand.u32 4294901760, %v302_v35  ;;  %v1605_v46 = vand.u32 4294901760, %v301_v36  ;;  %p1322_p3 = pnand %p1321_p1, %p1479_p4  ;;  %p1327_p8 = por %p1326_p7, %p1325_p12 }
  0x3a   : > { %v361_v37 = vand.u32 4294901760, %v360_v29  ;;  %v367_v38 = vand.u32 4294901760, %v366_v30  ;;  %323 = vmatpush.msra.mxu0 %v1533_v10  ;;  %466 = vmatpush.msra.mxu2 %v1546_v17  ;;  %v390_v47 = vsub.f32 %v1559_v21, %v389_v32  ;;  %v401_v48 = vand.u32 4294901760, %v1587_v33 }
  0x3b   : > { %519 = vmatpush.msra.mxu3 %v1533_v10  ;;  %v379_v50 = vand.u32 4294901760, %v378_v39  ;;  %v1614_v51 = vsub.f32 %v303_v34, %v1601_v44  ;;  %v1618_v52 = vsub.f32 %v302_v35, %v1603_v45  ;;  %v1620_v53 = vand.u32 4294901760, %v300_v42  ;;  %p1323_p5 = pneg %p1322_p3 }
  0x3c   : > { %362 = vmatpush.msra.mxu1 %v361_v37  ;;  %325 = vmatpush.msra.mxu0 %v1535_v11  ;;  %v396_v54 = vsub.f32 %v1571_v28, %v395_v41  ;;  %v385_v56 = vand.u32 4294901760, %v384_v40  ;;  %v1630_v58 = vsub.f32 %v301_v36, %v1605_v46  ;;  %v1632_v59 = vand.u32 4294901760, %v299_v49 }
  0x3d   : > { %469 = vmatpush.msra.mxu2 %v1553_v19  ;;  %521 = vmatpush.msra.mxu3 %v1535_v11  ;;  %v407_v57 = vand.u32 4294901760, %v1614_v51  ;;  %v391_v60 = vand.u32 4294901760, %v390_v47  ;;  %v402_v61 = vsub.f32 %v1587_v33, %v401_v48  ;;  %v413_v62 = vand.u32 4294901760, %v1618_v52  ;;  %v670_v19 = vld [vmem:[#allocation7 + $0x60] sm:$0xff]  ;;  %p1328_p9 = pnand %p1327_p8, %p1323_p5 }
  0x3e   : > { %368 = vmatpush.msra.mxu1 %v367_v38  ;;  %327 = vmatpush.msra.mxu0 %v1537_v12  ;;  %v1642_v63 = vsub.f32 %v300_v42, %v1620_v53  ;;  %v1644_v1 = vand.u32 4294901760, %v298_v55  ;;  %v397_v2 = vand.u32 4294901760, %v396_v54  ;;  %v419_v7 = vand.u32 4294901760, %v1630_v58 }
  0x3f   : > { %472 = vmatpush.msra.mxu2 %v1556_v20  ;;  %523 = vmatpush.msra.mxu3 %v1537_v12  ;;  %v408_v3 = vsub.f32 %v1614_v51, %v407_v57  ;;  %v1654_v8 = vsub.f32 %v299_v49, %v1632_v59  ;;  %v403_v9 = vand.u32 4294901760, %v402_v61  ;;  %v414_v13 = vsub.f32 %v1618_v52, %v413_v62  ;;  %v669_v20 = vld [vmem:[#allocation7 + $0x58] sm:$0xff] }
  0x40   : > { %374 = vmatpush.msra.mxu1 %v373_v43  ;;  %329 = vmatpush.msra.mxu0 %v1549_v18  ;;  %v425_v14 = vand.u32 4294901760, %v1642_v63  ;;  %v1664_v29 = vsub.f32 %v298_v55, %v1644_v1  ;;  %v420_v31 = vsub.f32 %v1630_v58, %v419_v7  ;;  %v297_v55 = vld [vmem:[#allocation5 + $0x8] sm:$0xff] }
  0x41   : > { %475 = vmatpush.msra.mxu2 %v1559_v21  ;;  %525 = vmatpush.msra.mxu3 %v1549_v18  ;;  %v409_v30 = vand.u32 4294901760, %v408_v3  ;;  %v431_v34 = vand.u32 4294901760, %v1654_v8  ;;  %v415_v36 = vand.u32 4294901760, %v414_v13  ;;  %v668_v21 = vld [vmem:[#allocation7 + $0x50] sm:$0xff] }
  0x42   : > { %380 = vmatpush.msra.mxu1 %v379_v50  ;;  %331 = vmatpush.msra.mxu0 %v1561_v22  ;;  %v426_v37 = vsub.f32 %v1642_v63, %v425_v14  ;;  %v437_v38 = vand.u32 4294901760, %v1664_v29  ;;  %v421_v40 = vand.u32 4294901760, %v420_v31 }
  0x43   : > { %478 = vmatpush.msra.mxu2 %v1571_v28  ;;  %527 = vmatpush.msra.mxu3 %v1561_v22  ;;  %v432_v42 = vsub.f32 %v1654_v8, %v431_v34 }
  0x44   : > { %386 = vmatpush.msra.mxu1 %v385_v56  ;;  %333 = vmatpush.msra.mxu0 %v1601_v44  ;;  %v427_v47 = vand.u32 4294901760, %v426_v37  ;;  %v438_v49 = vsub.f32 %v1664_v29, %v437_v38  ;;  %v344_v56 = vand.u32 4294901760, %v297_v55 }
  0x45   : > { %481 = vmatpush.msra.mxu2 %v1587_v33  ;;  %529 = vmatpush.msra.mxu3 %v1601_v44 }
  0x46   : > { %392 = vmatpush.msra.mxu1 %v391_v60  ;;  %335 = vmatpush.msra.mxu0 %v1603_v45  ;;  %v439_v54 = vand.u32 4294901760, %v438_v49  ;;  %v296_v60 = vld [vmem:[#allocation5] sm:$0xff]  ;;  %v442_v61 = vsub.f32 %v297_v55, %v344_v56 }
  0x47   : > { %484 = vmatpush.msra.mxu2 %v1614_v51  ;;  %531 = vmatpush.msra.mxu3 %v1603_v45 }
  0x48   : > { %398 = vmatpush.msra.mxu1 %v397_v2  ;;  %337 = vmatpush.msra.mxu0 %v1605_v46  ;;  %v346_v2 = vand.u32 4294901760, %v296_v60  ;;  %v443_v3 = vand.u32 4294901760, %v442_v61 }
  0x49   : > { %487 = vmatpush.msra.mxu2 %v1618_v52  ;;  %533 = vmatpush.msra.mxu3 %v1605_v46 }
  0x4a   : > { %404 = vmatpush.msra.mxu1 %v403_v9  ;;  %339 = vmatpush.msra.mxu0 %v1620_v53  ;;  %v448_v9 = vsub.f32 %v296_v60, %v346_v2  ;;  %v444_v13 = vsub.f32 %v442_v61, %v443_v3 }
  0x4b   : > { %490 = vmatpush.msra.mxu2 %v1630_v58  ;;  %535 = vmatpush.msra.mxu3 %v1620_v53 }
  0x4c   : > { %410 = vmatpush.msra.mxu1 %v409_v30  ;;  %341 = vmatpush.msra.mxu0 %v1632_v59  ;;  %v449_v30 = vand.u32 4294901760, %v448_v9  ;;  %v445_v31 = vand.u32 4294901760, %v444_v13 }
  0x4d   : > { %493 = vmatpush.msra.mxu2 %v1642_v63  ;;  %537 = vmatpush.msra.mxu3 %v1632_v59 }
  0x4e   : > { %416 = vmatpush.msra.mxu1 %v415_v36  ;;  %343 = vmatpush.msra.mxu0 %v1644_v1 }
  0x4f   : > { %496 = vmatpush.msra.mxu2 %v1654_v8  ;;  %539 = vmatpush.msra.mxu3 %v1644_v1 }
  0x50   : > { %422 = vmatpush.msra.mxu1 %v421_v40  ;;  %345 = vmatpush.msra.mxu0 %v344_v56  ;;  %v664_v40 = vld [vmem:[#allocation7 + $0x30] sm:$0xff] }
  0x51   : > { %499 = vmatpush.msra.mxu2 %v1664_v29  ;;  %541 = vmatpush.msra.mxu3 %v344_v56  ;;  %v665_v29 = vld [vmem:[#allocation7 + $0x38] sm:$0xff] }
  0x52   : > { %428 = vmatpush.msra.mxu1 %v427_v47  ;;  %347 = vmatpush.msra.mxu0 %v346_v2 }
  0x53   : > { %502 = vmatpush.msra.mxu2 %v442_v61  ;;  %543 = vmatpush.msra.mxu3 %v346_v2 }
  0x54   : > { %554 = vmatpush.msrb.mxu0 %v359_v23  ;;  %v1748_v23 = vand.u32 4294901760, %v670_v19 }
  0x55   : > { %505 = vmatpush.msra.mxu2 %v448_v9 }
  0x56   : > { %558 = vmatpush.msrb.mxu0 %v365_v24  ;;  %v1750_v24 = vand.u32 4294901760, %v669_v20 }
  0x58   : > { %562 = vmatpush.msrb.mxu0 %v371_v25  ;;  %v1752_v25 = vand.u32 4294901760, %v668_v21 }
  0x5a   : > { %566 = vmatpush.msrb.mxu0 %v377_v26  ;;  %v667_v26 = vld [vmem:[#allocation7 + $0x48] sm:$0xff] }
  0x5b   : > { %v1761_v33 = vand.u32 4294901760, %v667_v26 }
  0x5c   : > { %570 = vmatpush.msrb.mxu0 %v383_v27 }
  0x5e   : > { %574 = vmatpush.msrb.mxu0 %v389_v32 }
  0x60   : > { %578 = vmatpush.msrb.mxu0 %v395_v41 }
  0x62   : > { %582 = vmatpush.msrb.mxu0 %v401_v48 }
  0x64   : > { %586 = vmatpush.msrb.mxu0 %v407_v57 }
  0x66   : > { %590 = vmatpush.msrb.mxu0 %v413_v62 }
  0x68   : > { %594 = vmatpush.msrb.mxu0 %v419_v7 }
  0x6a   : > { %598 = vmatpush.msrb.mxu0 %v425_v14  ;;  %v666_v14 = vld [vmem:[#allocation7 + $0x40] sm:$0xff] }
  0x6b   : > { %v1804_v55 = vand.u32 4294901760, %v666_v14 }
  0x6c   : > { %602 = vmatpush.msrb.mxu0 %v431_v34 }
  0x6e   : > { %606 = vmatpush.msrb.mxu0 %v437_v38 }
  0x70   : > { %610 = vmatpush.msrb.mxu0 %v443_v3 }
  0x72   : > { %614 = vmatpush.msrb.mxu0 %v449_v30 }
  0xa4   : > { %v277_v35 = vpop.xlane.xlu0 %276 }
  0xa5   : > { %v278_v39 = vmul.f32 0.0078125, %v277_v35  ;;  %v450_v35 = vsub.f32 %v448_v9, %v449_v30  ;;  %v661_v9 = vld [vmem:[#allocation7 + $0x18] sm:$0xff]  ;;  %v1818_v30 = vsub.f32 %v666_v14, %v1804_v55 }
  0xa7   : > { %v1687_v43 = vsub.f32 %v1524_v0, %v278_v39  ;;  %v433_v0 = vand.u32 4294901760, %v432_v42  ;;  %v451_v36 = vand.u32 4294901760, %v450_v35  ;;  %v663_v42 = vld [vmem:[#allocation7 + $0x28] sm:$0xff]  ;;  %v660_v35 = vld [vmem:[#allocation7 + $0x10] sm:$0xff] }
  0xa8   : > { %v1815_v3 = vand.u32 4294901760, %v663_v42 }
  0xa9   : > { %v280_v50 = vmul.f32 %v1687_v43, %v1687_v43  ;;  %434 = vmatpush.msra.mxu1 %v433_v0 }
  0xab   : > { %281 = vadd.xlane.f32.xlu0 %v280_v50  ;;  %440 = vmatpush.msra.mxu1 %v439_v54  ;;  %v662_v50 = vld [vmem:[#allocation7 + $0x20] sm:$0xff] }
  0xad   : > { %446 = vmatpush.msra.mxu1 %v445_v31 }
  0xaf   : > { %452 = vmatpush.msra.mxu1 %v451_v36 }
  0xb1   : > { %621 = vmatpush.msrb.mxu1 %v1527_v4 }
  0xb3   : > { %623 = vmatpush.msrb.mxu1 %v1529_v5 }
  0xb5   : > { %625 = vmatpush.msrb.mxu1 %v1531_v6 }
  0xb7   : > { %627 = vmatpush.msrb.mxu1 %v1533_v10 }
  0xb9   : > { %629 = vmatpush.msrb.mxu1 %v1535_v11  ;;  %v673_v11 = vld [vmem:[#allocation7 + $0x78] sm:$0xff] }
  0xba   : > { %v1742_v17 = vand.u32 4294901760, %v673_v11 }
  0xbb   : > { %631 = vmatpush.msrb.mxu1 %v1537_v12  ;;  %v672_v12 = vld [vmem:[#allocation7 + $0x70] sm:$0xff] }
  0xbc   : > { %v1755_v28 = vsub.f32 %v673_v11, %v1742_v17  ;;  %679 = vmatpush.msrb.mxu2 %v1742_v17 }
  0xbd   : > { %633 = vmatpush.msrb.mxu1 %v1549_v18  ;;  %v1744_v18 = vand.u32 4294901760, %v672_v12 }
  0xbe   : > { %v721_v51 = vand.u32 4294901760, %v1755_v28 }
  0xbf   : > { %635 = vmatpush.msrb.mxu1 %v1561_v22  ;;  %v1746_v22 = vand.u32 4294901760, %v671_v15  ;;  %v1758_v32 = vsub.f32 %v672_v12, %v1744_v18  ;;  %681 = vmatpush.msrb.mxu2 %v1744_v18  ;;  %v1838_v12 = vsub.f32 %v663_v42, %v1815_v3 }
  0xc0   : > { %v722_v63 = vsub.f32 %v1755_v28, %v721_v51 }
  0xc1   : > { %637 = vmatpush.msrb.mxu1 %v1601_v44  ;;  %v1764_v41 = vsub.f32 %v671_v15, %v1746_v22  ;;  %v1767_v44 = vsub.f32 %v670_v19, %v1748_v23  ;;  %v727_v52 = vand.u32 4294901760, %v1758_v32  ;;  %683 = vmatpush.msrb.mxu2 %v1746_v22  ;;  %v1840_v15 = vand.u32 4294901760, %v661_v9 }
  0xc2   : > { %v723_v37 = vand.u32 4294901760, %v722_v63  ;;  %v1844_v19 = vand.u32 4294901760, %v660_v35 }
  0xc3   : > { %639 = vmatpush.msrb.mxu1 %v1603_v45  ;;  %v1770_v45 = vsub.f32 %v669_v20, %v1750_v24  ;;  %v739_v57 = vand.u32 4294901760, %v1767_v44  ;;  %685 = vmatpush.msrb.mxu2 %v1748_v23  ;;  %v1861_v14 = vsub.f32 %v661_v9, %v1840_v15 }
  0xc4   : > { %724 = vmatpush.msrb.mxu3 %v723_v37 }
  0xc5   : > { %641 = vmatpush.msrb.mxu1 %v1605_v46  ;;  %v1773_v46 = vsub.f32 %v668_v21, %v1752_v25  ;;  %v745_v58 = vand.u32 4294901760, %v1770_v45  ;;  %v740_v39 = vsub.f32 %v1767_v44, %v739_v57  ;;  %687 = vmatpush.msrb.mxu2 %v1750_v24 }
  0xc7   : > { %643 = vmatpush.msrb.mxu1 %v1620_v53  ;;  %v733_v53 = vand.u32 4294901760, %v1764_v41  ;;  %v751_v8 = vand.u32 4294901760, %v1773_v46  ;;  %v746_v47 = vsub.f32 %v1770_v45, %v745_v58  ;;  %v741_v13 = vand.u32 4294901760, %v740_v39  ;;  %689 = vmatpush.msrb.mxu2 %v1752_v25 }
  0xc9   : > { %645 = vmatpush.msrb.mxu1 %v1632_v59  ;;  %v1782_v59 = vsub.f32 %v667_v26, %v1761_v33  ;;  %v734_v7 = vsub.f32 %v1764_v41, %v733_v53  ;;  %v752_v61 = vsub.f32 %v1773_v46, %v751_v8  ;;  %691 = vmatpush.msrb.mxu2 %v1761_v33 }
  0xcb   : > { %647 = vmatpush.msrb.mxu1 %v1644_v1  ;;  %v728_v1 = vsub.f32 %v1758_v32, %v727_v52  ;;  %v757_v49 = vand.u32 4294901760, %v1782_v59  ;;  %v735_v54 = vand.u32 4294901760, %v734_v7  ;;  %v753_v20 = vand.u32 4294901760, %v752_v61  ;;  %693 = vmatpush.msrb.mxu2 %v1804_v55 }
  0xcc   : > { %v781_v7 = vand.u32 4294901760, %v1838_v12 }
  0xcd   : > { %649 = vmatpush.msrb.mxu1 %v344_v56  ;;  %v729_v38 = vand.u32 4294901760, %v728_v1  ;;  %v1807_v56 = vand.u32 4294901760, %v665_v29 }
  0xcf   : > { %651 = vmatpush.msrb.mxu1 %v346_v2  ;;  %v1813_v2 = vand.u32 4294901760, %v664_v40  ;;  %730 = vmatpush.msrb.mxu3 %v729_v38  ;;  %v1821_v31 = vsub.f32 %v665_v29, %v1807_v56 }
  0xd0   : > { %695 = vmatpush.msrb.mxu2 %v1807_v56 }
  0xd1   : > { %736 = vmatpush.msrb.mxu3 %v735_v54  ;;  %v769_v11 = vand.u32 4294901760, %v1821_v31 }
  0xd2   : > { %697 = vmatpush.msrb.mxu2 %v1813_v2 }
  0xd3   : > { %742 = vmatpush.msrb.mxu3 %v741_v13  ;;  %v770_v1 = vsub.f32 %v1821_v31, %v769_v11 }
  0xd4   : > { %699 = vmatpush.msrb.mxu2 %v1815_v3 }
 0x11e   : > { %v282_v4 = vpop.xlane.xlu0 %281 }
 0x11f   : > { %v283_v5 = vmul.f32 0.0078125, %v282_v4  ;;  %v747_v4 = vand.u32 4294901760, %v746_v47  ;;  %v771_v47 = vand.u32 4294901760, %v770_v1 }
 0x121   : > { %v284_v6 = vadd.f32 1e-05, %v283_v5  ;;  %v758_v5 = vsub.f32 %v1782_v59, %v757_v49  ;;  %748 = vmatpush.msrb.mxu3 %v747_v4 }
 0x123   : > { %1212 = vrsqrt.f32 %v284_v6  ;;  %vm291_vm1 = vweird.f32 %v284_v6  ;;  %v759_v63 = vand.u32 4294901760, %v758_v5  ;;  %754 = vmatpush.msrb.mxu3 %v753_v20 }
 0x125   : > { %760 = vmatpush.msrb.mxu3 %v759_v63 }
 0x129   : > { %v1213_v10 = vpop.eup %1212 }
 0x12a   : > { %v286_v16 = vmul.f32 %v1213_v10, %v284_v6  ;;  %vm292_vm0 = vweird.f32 %v1213_v10  ;;  %v1832_v6 = vsub.f32 %v664_v40, %v1813_v2 }
 0x12b   : > { %vm293_vm2 = vmor %vm291_vm1, %vm292_vm0 }
 0x12c   : > { %v287_v27 = vmul.f32 %v1213_v10, %v286_v16  ;;  %v775_v26 = vand.u32 4294901760, %v1832_v6 }
 0x12e   : > { %v288_v48 = vmul.f32 0.5, %v287_v27  ;;  %v776_v38 = vsub.f32 %v1832_v6, %v775_v26 }
 0x130   : > { %v289_v62 = vsub.f32 1.5, %v288_v48 }
 0x132   : > { %v290_v34 = vmul.f32 %v1213_v10, %v289_v62  ;;  %v659_v62 = vld [vmem:[#allocation7 + $0x8] sm:$0xff] }
 0x133   : > { %v1872_v40 = vand.u32 4294901760, %v659_v62 }
 0x134   : > { %v294_v0 = vsel %vm293_vm2, %v1213_v10, %v290_v34  ;;  %v763_v10 = vand.u32 4294901760, %v1818_v30  ;;  %v1864_v34 = vsub.f32 %v660_v35, %v1844_v19 }
 0x135   : > { %v295_v60 = vmul.f32 %v294_v0, %v1687_v43  ;;  %v1824_v43 = vand.u32 4294901760, %v662_v50  ;;  %v793_v0 = vand.u32 4294901760, %v1861_v14  ;;  %v1881_v54 = vsub.f32 %v659_v62, %v1872_v40 }
 0x136   : > { %v764_v21 = vsub.f32 %v1818_v30, %v763_v10  ;;  %v799_v9 = vand.u32 4294901760, %v1864_v34 }
 0x137   : > { %v1826_v36 = vand.u32 4294901760, %v295_v60  ;;  %v1852_v27 = vsub.f32 %v662_v50, %v1824_v43  ;;  %v782_v50 = vsub.f32 %v1838_v12, %v781_v7  ;;  %701 = vmatpush.msrb.mxu2 %v1824_v43  ;;  %v794_v35 = vsub.f32 %v1861_v14, %v793_v0 }
 0x138   : > { %v765_v37 = vand.u32 4294901760, %v764_v21  ;;  %v805_v4 = vand.u32 4294901760, %v1881_v54 }
 0x139   : > { %454 = vmatmul.f32.vlgmr.msra.gmra.mxu1 %v1826_v36  ;;  %v349_v16 = vsub.f32 %v295_v60, %v1826_v36  ;;  %v787_v39 = vand.u32 4294901760, %v1852_v27  ;;  %v777_v60 = vand.u32 4294901760, %v776_v38  ;;  %v783_v13 = vand.u32 4294901760, %v782_v50  ;;  %703 = vmatpush.msrb.mxu2 %v1840_v15 }
 0x13a   : > { %875 = vmatpush.msra.mxu1 %v1742_v17  ;;  %766 = vmatpush.msrb.mxu3 %v765_v37  ;;  %v795_v20 = vand.u32 4294901760, %v794_v35  ;;  %v806_v21 = vsub.f32 %v1881_v54, %v805_v4 }
 0x13b   : > { %508 = vmatmul.f32.vlgmr.msra.gmra.mxu2 %v349_v16  ;;  %v350_v48 = vand.u32 4294901760, %v349_v16  ;;  %v788_v61 = vsub.f32 %v1852_v27, %v787_v39 }
 0x13c   : > { %877 = vmatpush.msra.mxu1 %v1744_v18  ;;  %772 = vmatpush.msrb.mxu3 %v771_v47  ;;  %v807_v62 = vand.u32 4294901760, %v806_v21 }
 0x13d   : > { %547 = vmatmul.f32.vlgmr.msra.gmra.mxu3 %v350_v48  ;;  %v351_v29 = vsub.f32 %v349_v16, %v350_v48  ;;  %v789_v5 = vand.u32 4294901760, %v788_v61  ;;  %v800_v16 = vsub.f32 %v1864_v34, %v799_v9  ;;  %705 = vmatpush.msrb.mxu2 %v1844_v19 }
 0x13e   : > { %879 = vmatpush.msra.mxu1 %v1746_v22  ;;  %778 = vmatpush.msrb.mxu3 %v777_v60 }
 0x13f   : > { %v352_v42 = vand.u32 4294901760, %v351_v29  ;;  %707 = vmatpush.msrb.mxu2 %v1872_v40  ;;  %v801_v48 = vand.u32 4294901760, %v800_v16 }
 0x140   : > { %881 = vmatpush.msra.mxu1 %v1748_v23  ;;  %784 = vmatpush.msrb.mxu3 %v783_v13 }
 0x141   : > { %353 = vmatmul.f32.vlgmr.msra.gmra.mxu0 %v352_v42  ;;  %653 = vmatmul.f32.vlgmr.msrb.gmra.mxu1 %v1826_v36 }
 0x142   : > { %822 = vmatpush.msra.mxu0 %v1755_v28  ;;  %883 = vmatpush.msra.mxu1 %v1750_v24 }
 0x143   : > { %790 = vmatpush.msrb.mxu3 %v789_v5 }
 0x144   : > { %825 = vmatpush.msra.mxu0 %v1758_v32  ;;  %885 = vmatpush.msra.mxu1 %v1752_v25 }
 0x145   : > { %796 = vmatpush.msrb.mxu3 %v795_v20 }
 0x146   : > { %828 = vmatpush.msra.mxu0 %v1764_v41  ;;  %887 = vmatpush.msra.mxu1 %v1761_v33 }
 0x147   : > { %802 = vmatpush.msrb.mxu3 %v801_v48 }
 0x148   : > { %831 = vmatpush.msra.mxu0 %v1767_v44  ;;  %889 = vmatpush.msra.mxu1 %v1804_v55 }
 0x149   : > { %616 = vmatmul.f32.vlgmr.msrb.gmra.mxu0 %v1826_v36  ;;  %808 = vmatpush.msrb.mxu3 %v807_v62  ;;  %v658_v36 = vld [vmem:[#allocation7] sm:$0xff] }
 0x14a   : > { %834 = vmatpush.msra.mxu0 %v1770_v45  ;;  %891 = vmatpush.msra.mxu1 %v1807_v56  ;;  %v708_v63 = vand.u32 4294901760, %v658_v36 }
 0x14c   : > { %837 = vmatpush.msra.mxu0 %v1773_v46  ;;  %893 = vmatpush.msra.mxu1 %v1813_v2  ;;  %v810_v1 = vsub.f32 %v658_v36, %v708_v63 }
 0x14d   : > { %709 = vmatpush.msrb.mxu2 %v708_v63 }
 0x14e   : > { %840 = vmatpush.msra.mxu0 %v1782_v59  ;;  %895 = vmatpush.msra.mxu1 %v1815_v3  ;;  %v811_v29 = vand.u32 4294901760, %v810_v1 }
 0x14f   : > { %916 = vmatpush.msra.mxu2 %v721_v51 }
 0x150   : > { %843 = vmatpush.msra.mxu0 %v1818_v30  ;;  %897 = vmatpush.msra.mxu1 %v1824_v43  ;;  %v812_v37 = vsub.f32 %v810_v1, %v811_v29 }
 0x151   : > { %920 = vmatpush.msra.mxu2 %v727_v52 }
 0x152   : > { %846 = vmatpush.msra.mxu0 %v1821_v31  ;;  %899 = vmatpush.msra.mxu1 %v1840_v15  ;;  %v813_v38 = vand.u32 4294901760, %v812_v37 }
 0x153   : > { %924 = vmatpush.msra.mxu2 %v733_v53 }
 0x154   : > { %849 = vmatpush.msra.mxu0 %v1832_v6  ;;  %901 = vmatpush.msra.mxu1 %v1844_v19 }
 0x155   : > { %928 = vmatpush.msra.mxu2 %v739_v57  ;;  %814 = vmatpush.msrb.mxu3 %v813_v38 }
 0x156   : > { %852 = vmatpush.msra.mxu0 %v1838_v12  ;;  %903 = vmatpush.msra.mxu1 %v1872_v40 }
 0x157   : > { %983 = vmatpush.msra.mxu3 %v1742_v17  ;;  %932 = vmatpush.msra.mxu2 %v745_v58  ;;  %v1210_v17 = vld [vmem:[%s2018_s2] ss:$0 sm:$0xff] }
 0x158   : > { %855 = vmatpush.msra.mxu0 %v1852_v27  ;;  %905 = vmatpush.msra.mxu1 %v708_v63 }
 0x159   : > { %985 = vmatpush.msra.mxu3 %v1744_v18  ;;  %936 = vmatpush.msra.mxu2 %v751_v8  ;;  %v1211_v8 = vld [vmem:[%s2020_s4] ss:$0 sm:$0xff] }
 0x15a   : > { %858 = vmatpush.msra.mxu0 %v1861_v14 }
 0x15b   : > { %987 = vmatpush.msra.mxu3 %v1746_v22  ;;  %940 = vmatpush.msra.mxu2 %v757_v49 }
 0x15c   : > { %861 = vmatpush.msra.mxu0 %v1864_v34 }
 0x15d   : > { %989 = vmatpush.msra.mxu3 %v1748_v23  ;;  %944 = vmatpush.msra.mxu2 %v763_v10 }
 0x15e   : > { %864 = vmatpush.msra.mxu0 %v1881_v54 }
 0x15f   : > { %991 = vmatpush.msra.mxu3 %v1750_v24  ;;  %948 = vmatpush.msra.mxu2 %v769_v11 }
 0x160   : > { %867 = vmatpush.msra.mxu0 %v810_v1 }
 0x161   : > { %993 = vmatpush.msra.mxu3 %v1752_v25  ;;  %952 = vmatpush.msra.mxu2 %v775_v26 }
 0x163   : > { %995 = vmatpush.msra.mxu3 %v1761_v33  ;;  %956 = vmatpush.msra.mxu2 %v781_v7 }
 0x165   : > { %997 = vmatpush.msra.mxu3 %v1804_v55  ;;  %960 = vmatpush.msra.mxu2 %v787_v39 }
 0x167   : > { %999 = vmatpush.msra.mxu3 %v1807_v56  ;;  %964 = vmatpush.msra.mxu2 %v793_v0 }
 0x169   : > { %1001 = vmatpush.msra.mxu3 %v1813_v2  ;;  %968 = vmatpush.msra.mxu2 %v799_v9 }
 0x16b   : > { %1003 = vmatpush.msra.mxu3 %v1815_v3  ;;  %972 = vmatpush.msra.mxu2 %v805_v4 }
 0x16d   : > { %1005 = vmatpush.msra.mxu3 %v1824_v43  ;;  %976 = vmatpush.msra.mxu2 %v811_v29 }
 0x16f   : > { %1007 = vmatpush.msra.mxu3 %v1840_v15 }
 0x171   : > { %1009 = vmatpush.msra.mxu3 %v1844_v19 }
 0x173   : > { %1011 = vmatpush.msra.mxu3 %v1872_v40 }
 0x175   : > { %1013 = vmatpush.msra.mxu3 %v708_v63 }
 0x1b6   : > { %v455_v18 = vpop.f32.mrf.mxu1 }
 0x1be   : > { %v354_v22 = vpop.f32.mrf.mxu0  ;;  %v509_v25 = vpop.f32.mrf.mxu2 }
 0x1bf   : > { %v355_v23 = vadd.f32 %v1210_v17, %v354_v22  ;;  %v654_v45 = vpop.f32.mrf.mxu1 }
 0x1c0   : > { %v548_v32 = vpop.f32.mrf.mxu3 }
 0x1c1   : > { %v456_v24 = vadd.f32 %v455_v18, %v355_v23 }
 0x1c3   : > { %v510_v28 = vadd.f32 %v509_v25, %v456_v24 }
 0x1c5   : > { %v549_v33 = vadd.f32 %v548_v32, %v510_v28 }
 0x1c6   : > { %v617_v41 = vpop.f32.mrf.mxu0 }
 0x1c7   : > { %v618_v44 = vadd.f32 %v617_v41, %v549_v33 }
 0x1c9   : > { %v655_v46 = vadd.f32 %v654_v45, %v618_v44 }
 0x1cb   : > { %v657_v51 = vmax.f32 %v655_v46, 0.0 }
 0x1cd   : > { %v710_v52 = vand.u32 4294901760, %v657_v51 }
 0x1cf   : > { %v711_v53 = vsub.f32 %v657_v51, %v710_v52  ;;  %816 = vmatmul.f32.vlgmr.msrb.gmra.mxu3 %v710_v52 }
 0x1d1   : > { %870 = vmatmul.f32.vlgmr.msra.gmra.mxu0 %v711_v53  ;;  %v712_v57 = vand.u32 4294901760, %v711_v53 }
 0x1d3   : > { %909 = vmatmul.f32.vlgmr.msra.gmra.mxu1 %v712_v57  ;;  %v713_v58 = vsub.f32 %v711_v53, %v712_v57 }
 0x1d5   : > { %v714_v59 = vand.u32 4294901760, %v713_v58 }
 0x1d7   : > { %715 = vmatmul.f32.vlgmr.msrb.gmra.mxu2 %v714_v59  ;;  %1015 = vmatmul.f32.vlgmr.msra.gmra.mxu3 %v710_v52 }
 0x1df   : > { %978 = vmatmul.f32.vlgmr.msra.gmra.mxu2 %v710_v52 }
 0x24e   : > { %v871_v3 = vpop.f32.mrf.mxu0 }
 0x250   : > { %v910_v31 = vpop.f32.mrf.mxu1 }
 0x252   : > { %v817_v49 = vpop.f32.mrf.mxu3 }
 0x25a   : > { %v716_v55 = vpop.f32.mrf.mxu2  ;;  %v1016_v11 = vpop.f32.mrf.mxu3 }
 0x25b   : > { %v717_v56 = vadd.f32 %v1211_v8, %v716_v55 }
 0x25d   : > { %v818_v2 = vadd.f32 %v817_v49, %v717_v56 }
 0x25f   : > { %v872_v30 = vadd.f32 %v871_v3, %v818_v2 }
 0x261   : > { %v911_v43 = vadd.f32 %v910_v31, %v872_v30 }
 0x262   : > { %v979_v6 = vpop.f32.mrf.mxu2 }
 0x263   : > { %v980_v10 = vadd.f32 %v979_v6, %v911_v43 }
 0x265   : > { %v1017_v12 = vadd.f32 %v1016_v11, %v980_v10 }
 0x267   : > { %1019 = vst [vmem:[%s274_s28] sm:$0xff] %v1017_v12 }
 0x268   : > { %1331 = shalt.err (!%p1328_p9)
}
 0x269   : > { %1151 = dma.vmem_to_hbm [thread:$0]  (%p1479_p4), %s1034_s29, 128, %s1036_s30, %s1021_s25  }
 0x26a PF: > { %s1047_s22 = sand.u32 1, %s1362_s18   ;;  %p2028_p10 = scmp.ge.s32.totalorder %s1374_s21, 2 }
 0x26b   : > { %s1048_s9 = scalar_lea.sflag [#allocation4], %s1047_s22 }
 0x26c   : > { %p1165_p13 = pnand %p2028_p10, %p1483_p6 }
 0x26e   : > { %p1166_p11 = pneg %p1165_p13 }
 0x270   : > { %1357 = dma.done.wait (%p1166_p11), %s1048_s9, 128  }
 0x271   : > { %1359 = vsyncadd (%p1166_p11), %s1048_s9, 4294967168  ;;  %p19_p0 = scmp.ge.s32.totalorder %s1453_s12, 4   ;;  %s2029_s18 = smov %s1366_s19 }
 0x272   : > { %s2030_s19 = smov %s1370_s20  ;;  %s2031_s20 = smov %s1464_s15 }
 0x273   : > { %s2032_s21 = smov %s1453_s12  ;;  %21 = sbr.rel (!%p19_p0) target bundleno = 6 (0x6), region = 93 }
 0x278   :  { %1054 = vsyncpa [#allocation3], 1 }
 0x279   :  { %1056 = vsyncpa [#allocation3 + $0x1], 1 }
 0x27a   :  { %1057 = vsyncpa [#allocation6], 1 }
 0x27b   :  { %1058 = vsyncpa [#allocation4], 1 }
 0x27c   :  { %1060 = vsyncpa [#allocation4 + $0x1], 1 }

</bundles_post_ra>
